<compile_context>
chip_gen: v7x
topology: tpu7x:2x2x1
jax: 0.10.0
libtpu: 0.0.40
codegen_flags: <defaults>
</compile_context>

<pallas_src>
import functools

import numpy as np
import jax
import jax.numpy as jnp
from jax.experimental import pallas as pl
from jax.experimental.pallas import tpu as pltpu


def _vmem_limit():
    """Per-generation VMEM budget: ~7/8 of physical capacity (~56 MiB on 64 MiB
    v7x, ~112 MiB on 128 MiB v5e/v6e), with a conservative fallback."""
    try:
        cap = int(pltpu.get_tpu_info().vmem_capacity_bytes)
        return max(32 * 1024 * 1024, min(cap * 7 // 8, 112 * 1024 * 1024))
    except Exception:
        return 48 * 1024 * 1024


# ----------------------- Tiled Pallas linear: y = x @ wT (+ b) -----------------------
def _matmul_kernel(x_ref, w_ref, o_ref, acc_ref):
    @pl.when(pl.program_id(2) == 0)
    def _():
        acc_ref[...] = jnp.zeros_like(acc_ref)

    acc_ref[...] += jnp.dot(x_ref[...].astype(jnp.bfloat16),
                            w_ref[...].astype(jnp.bfloat16),
                            preferred_element_type=jnp.float32)

    @pl.when(pl.program_id(2) == pl.num_programs(2) - 1)
    def _():
        o_ref[...] = acc_ref[...].astype(o_ref.dtype)


def _matmul_bias_kernel(x_ref, w_ref, b_ref, o_ref, acc_ref):
    @pl.when(pl.program_id(2) == 0)
    def _():
        acc_ref[...] = jnp.zeros_like(acc_ref)

    acc_ref[...] += jnp.dot(x_ref[...].astype(jnp.bfloat16),
                            w_ref[...].astype(jnp.bfloat16),
                            preferred_element_type=jnp.float32)

    @pl.when(pl.program_id(2) == pl.num_programs(2) - 1)
    def _():
        o_ref[...] = (acc_ref[...] + b_ref[...]).astype(o_ref.dtype)


def _pick_tile(dim, target, align):
    """Largest `align`-aligned tile <= target that divides dim; else the full dim."""
    if dim <= target:
        return dim
    t = (target // align) * align
    while t >= align:
        if dim % t == 0:
            return t
        t -= align
    return dim


def pallas_linear(x2d, wT, b=None, *, out_dtype=jnp.float32,
                  tm_target=512, tn_target=512, tk_target=1024):
    """x2d: (M, K); wT: (K, O) pre-transposed weight; b: (O,) f32 or None -> (M, O).

    Tiled + pipelined matmul, bf16 MXU operands, f32 VMEM accumulator over the K
    ("arbitrary") grid axis, bias added at finalize.
    """
    M, K = x2d.shape
    K2, O = wT.shape
    assert K2 == K
    tm = _pick_tile(M, tm_target, 8)
    tn = _pick_tile(O, tn_target, 128)
    tk = _pick_tile(K, tk_target, 128)
    grid = (M // tm, O // tn, K // tk)

    in_specs = [
        pl.BlockSpec((tm, tk), lambda i, j, k: (i, k)),
        pl.BlockSpec((tk, tn), lambda i, j, k: (k, j)),
    ]
    operands = [x2d, wT]
    kernel = _matmul_kernel
    if b is not None:
        in_specs.append(pl.BlockSpec((1, tn), lambda i, j, k: (0, j)))
        operands.append(jnp.asarray(b, jnp.float32).reshape(1, O))
        kernel = _matmul_bias_kernel

    return pl.pallas_call(
        kernel,
        out_shape=jax.ShapeDtypeStruct((M, O), out_dtype),
        grid=grid,
        in_specs=in_specs,
        out_specs=pl.BlockSpec((tm, tn), lambda i, j, k: (i, j)),
        scratch_shapes=[pltpu.VMEM((tm, tn), jnp.float32)],
        compiler_params=pltpu.CompilerParams(
            dimension_semantics=("parallel", "parallel", "arbitrary"),
            vmem_limit_bytes=_vmem_limit(),
        ),
    )(*operands)


# ------------------- Pallas TC-attention core: grid = (batch, T) -------------------
def _tc_attn_kernel(qkv_ref, w_ref, o_ref, acc_k_ref, acc_v_ref, *,
                    scale, num_heads, head_dim):
    H, D = num_heads, head_dim
    C = H * D
    N = qkv_ref.shape[0]
    t = pl.program_id(1)

    # Running w[t]*k / w[t]*v sums live in VMEM scratch and carry across the
    # "arbitrary" T axis; re-init at the start of each batch element's sweep.
    @pl.when(t == 0)
    def _():
        acc_k_ref[...] = jnp.zeros_like(acc_k_ref)
        acc_v_ref[...] = jnp.zeros_like(acc_v_ref)

    # One (N, 3C) slab straight out of the qkv-linear layout (channel order:
    # qkv-major, head, d).  f32 for accumulation (v5e has no bf16 VPU).
    slab = qkv_ref[...].astype(jnp.float32)

    def heads(x_nc):                      # (N, C) -> (H, N, D)
        return jnp.transpose(x_nc.reshape(N, H, D), (1, 0, 2))

    q = heads(slab[:, :C])
    k = heads(slab[:, C:2 * C])
    v = heads(slab[:, 2 * C:])

    wt = w_ref[t]                                          # SMEM scalar (f32)
    # k_new = cumsum_t(w*k), v_new = cumsum_t(w*v); q*scale folded into acc_k.
    acc_k_ref[...] = acc_k_ref[...] + (wt * scale) * k
    acc_v_ref[...] = acc_v_ref[...] + wt * v

    # Batched-over-heads logits on the MXU: bf16 operands, f32 accumulation.
    s = jnp.einsum("hnd,hmd->hnm",
                   q.astype(jnp.bfloat16),
                   acc_k_ref[...].astype(jnp.bfloat16),
                   preferred_element_type=jnp.float32)     # (H, N, N)

    # torch.tril semantics: upper-triangle entries are set to 0 (NOT -inf) and
    # still participate in the softmax — reproduce exactly.
    row = jax.lax.broadcasted_iota(jnp.int32, (N, N), 0)
    col = jax.lax.broadcasted_iota(jnp.int32, (N, N), 1)
    s = jnp.where((col <= row)[None], s, 0.0)

    # Explicit softmax; the divide goes to the EUP via approximate reciprocal.
    m = jnp.max(s, axis=-1, keepdims=True)
    e = jnp.exp(s - m)
    p = e * pl.reciprocal(jnp.sum(e, axis=-1, keepdims=True), approx=True)

    # attn_drop / proj_drop have p=0.0 -> identity.
    o = jnp.einsum("hnm,hmd->hnd",
                   p.astype(jnp.bfloat16),
                   acc_v_ref[...].astype(jnp.bfloat16),
                   preferred_element_type=jnp.float32)     # (H, N, D)

    # Lane-dense (N, C) store: one slab per step, no D-wide masked stores.
    o_ref[...] = jnp.transpose(o, (1, 0, 2)).reshape(N, C).astype(o_ref.dtype)


def pallas_tc_attention(qkv, tmp_weighting, scale, *, num_heads, head_dim,
                        out_dtype=jnp.bfloat16):
    """qkv: (batch, T, N, 3*H*D) in raw qkv-linear channel order.
    Returns (batch, T, N, H*D) in `out_dtype`."""
    batch, T, N, threeC = qkv.shape
    H, D = num_heads, head_dim
    C = H * D
    assert threeC == 3 * C

    kernel = functools.partial(_tc_attn_kernel, scale=scale,
                               num_heads=H, head_dim=D)
    return pl.pallas_call(
        kernel,
        out_shape=jax.ShapeDtypeStruct((batch, T, N, C), out_dtype),
        grid=(batch, T),
        in_specs=[
            # One (N, 3C) slab per (b, t) step; q/k/v are sliced inside the kernel
            # straight out of the qkv-linear layout (no transpose glue in HBM).
            pl.BlockSpec((None, None, N, threeC), lambda b, t: (b, t, 0, 0)),
            pl.BlockSpec(memory_space=pltpu.MemorySpace.SMEM),   # tmp_weighting (T,)
        ],
        out_specs=pl.BlockSpec((None, None, N, C), lambda b, t: (b, t, 0, 0)),
        scratch_shapes=[pltpu.VMEM((H, N, D), jnp.float32),      # acc_k (carried over T)
                        pltpu.VMEM((H, N, D), jnp.float32)],     # acc_v
        compiler_params=pltpu.CompilerParams(
            dimension_semantics=("parallel", "arbitrary"),
            vmem_limit_bytes=_vmem_limit(),
        ),
    )(qkv, tmp_weighting)


# ------------------------------- Module glue -------------------------------
def shift_jax(x, fold_div=3):
    B, t, c = x.shape
    fold = c // fold_div
    out = jnp.zeros_like(x)
    out = out.at[:, :-1, :fold].set(x[:, 1:, :fold])
    out = out.at[:, 1:, fold: 2 * fold].set(x[:, :-1, fold: 2 * fold])
    out = out.at[:, :, 2 * fold:].set(x[:, :, 2 * fold:])
    return out


def prepare_params(params):
    """One-time weight prep: transpose torch-style (O, K) weights to (K, O) and
    cast to bf16, so no per-call transpose / cast round-trips."""
    return {
        "wT_qkv": jnp.asarray(params["w_qkv"]).astype(jnp.bfloat16).T,    # (C, 3C)
        "wT_proj": jnp.asarray(params["w_proj"]).astype(jnp.bfloat16).T,  # (C, C)
        "b_proj": jnp.asarray(params["b_proj"], jnp.float32),
        "tmp_weighting": jnp.asarray(params["tmp_weighting"], jnp.float32),
    }


def tc_attention_forward(x, batch, prepared, num_heads, attn_res=None, shift=False):
    B, N, C = x.shape
    H = num_heads
    D = C // H
    T = B // batch
    scale = float(D) ** -0.5

    xr = x.reshape(batch, T * N, C)
    if shift:
        xr = shift_jax(xr)
    x2d = xr.reshape(batch * T * N, C).astype(jnp.bfloat16)

    # qkv linear (no bias): bf16 in/out, f32 accumulation inside the kernel.
    qkv2d = pallas_linear(x2d, prepared["wT_qkv"], None, out_dtype=jnp.bfloat16)
    qkv = qkv2d.reshape(batch, T, N, 3 * C)                      # free reshape

    # q_norm / k_norm are Identity (qk_norm=False).
    # TODO(synk): attn_res residual-blend path (sigmoid(alpha) mix of attention
    # matrices) not implemented; default attn_res=None.
    o = pallas_tc_attention(qkv, prepared["tmp_weighting"], scale,
                            num_heads=H, head_dim=D)             # (batch, T, N, C) bf16

    # Reconcile with torch's x.transpose(1, 2).reshape(B, N, C): the module
    # flattens the (batch, H, T, N, D) contiguous order, so transpose the
    # lane-dense kernel output once (on bf16 data) and reinterpret.
    o_t = jnp.transpose(o.reshape(batch, T, N, H, D), (0, 3, 1, 2, 4))  # (batch,H,T,N,D)
    x_rows = o_t.reshape(B * N, C)

    xo = pallas_linear(x_rows, prepared["wT_proj"], prepared["b_proj"],
                       out_dtype=jnp.float32)
    return xo.reshape(B, N, C), attn_res


# ------------------------------- Pure-JAX reference -------------------------------
def reference_forward(x, batch, params, num_heads):
    B, N, C = x.shape
    H = num_heads
    D = C // H
    T = B // batch
    scale = float(D) ** -0.5

    xr = x.reshape(batch, T * N, C)
    qkv = xr @ params["w_qkv"].T
    qkv = qkv.reshape(batch, T, N, 3, H, D)
    qkv = jnp.transpose(qkv, (3, 0, 1, 4, 2, 5))  # (3, batch, T, H, N, D)
    q, k, v = qkv[0], qkv[1], qkv[2]

    w = params["tmp_weighting"][None, :, None, None, None]
    v_new = jnp.cumsum(v * w, axis=1)
    k_new = jnp.cumsum(k * w, axis=1)

    q = q * scale
    attn = jnp.einsum("bthnd,bthmd->bthnm", q, k_new)
    mask = jnp.tril(jnp.ones((N, N), dtype=bool))
    attn = jnp.where(mask, attn, 0.0)
    attn = jax.nn.softmax(attn, axis=-1)
    xo = jnp.einsum("bthnm,bthmd->bthnd", attn, v_new)
    xo = jnp.transpose(xo, (0, 2, 1, 3, 4)).reshape(B, N, C)
    xo = xo @ params["w_proj"].T + params["b_proj"]
    return xo


# ------------------------------- main -------------------------------
if __name__ == "__main__":
    # Small, forward-consistent shapes: dim=32, heads=4 (head_dim=8),
    # num_tmp_tokens=T=4, batch=2 -> B = batch*T = 8, seq N = 8.
    C = 32
    H = 4
    T = 4          # num_tmp_tokens
    batch = 2
    B = batch * T  # = 8
    N = 8

    key = jax.random.PRNGKey(0)
    k_qkv, k_proj_w, k_proj_b, k_x = jax.random.split(key, 4)
    params = {
        "w_qkv": jax.random.normal(k_qkv, (3 * C, C), jnp.float32) * 0.02,
        "w_proj": jax.random.normal(k_proj_w, (C, C), jnp.float32) * 0.02,
        "b_proj": jax.random.normal(k_proj_b, (C,), jnp.float32) * 0.02,
        "tmp_weighting": jnp.ones((T,), jnp.float32),  # nn.Parameter(torch.ones(T))
        "alpha": jnp.array([0.5], jnp.float32),        # unused (attn_res=None)
    }
    prepared = prepare_params(params)

    x = jax.random.normal(k_x, (B, N, C), jnp.float32)

    out, attn_res = tc_attention_forward(x, batch, prepared, num_heads=H)
    out = jax.block_until_ready(out)

    ref = jax.block_until_ready(reference_forward(x, batch, params, num_heads=H))
    # bf16 MXU operands + bf16 inter-kernel activations -> looser tolerance vs f32 ref.
    np.testing.assert_allclose(np.asarray(out), np.asarray(ref), rtol=5e-2, atol=5e-3)
    assert out.shape == (B, N, C)
    assert attn_res is None

    print("KERNEL_OK")
</pallas_src>

<mosaic_0001>
module attributes {stable_mosaic.version = 11 : i64} {
  func.func @_matmul_kernel(%arg0: i32, %arg1: i32, %arg2: i32, %arg3: memref<64x32xbf16, #tpu.memory_space<vmem>>, %arg4: memref<32x96xbf16, #tpu.memory_space<vmem>>, %arg5: memref<64x96xbf16, #tpu.memory_space<vmem>>, %arg6: memref<64x96xf32, #tpu.memory_space<vmem>>) attributes {dimension_semantics = [#tpu.dimension_semantics<parallel>, #tpu.dimension_semantics<parallel>, #tpu.dimension_semantics<arbitrary>], iteration_bounds = array<i64: 1, 1, 1>, scalar_prefetch = 0 : i64, scratch_operands = 1 : i64, tpu.core_type = #tpu.core_type<tc>, window_params = [{transform_indices = @transform_0, window_bounds = array<i64: 64, 32>}, {transform_indices = @transform_1, window_bounds = array<i64: 32, 96>}, {transform_indices = @transform_2, window_bounds = array<i64: 64, 96>}]} {
    %c0_i32 = arith.constant 0 : i32
    %0 = arith.cmpi eq, %arg2, %c0_i32 : i32
    %1 = arith.extui %0 : i1 to i32
    %c0_i32_0 = arith.constant 0 : i32
    %2 = arith.cmpi ne, %1, %c0_i32_0 : i32
    scf.if %2 {
      %cst_10 = arith.constant 0.000000e+00 : f32
      %12 = vector.broadcast %cst_10 : f32 to vector<64x96xf32>
      %c0_11 = arith.constant 0 : index
      %c0_12 = arith.constant 0 : index
      %13 = vector.load %arg6[%c0_11, %c0_12] : memref<64x96xf32, #tpu.memory_space<vmem>>, vector<64x96xf32>
      tpu.vector_store %arg6[%c0_11, %c0_12], %12 {strides = array<i32>} : memref<64x96xf32, #tpu.memory_space<vmem>>, vector<64x96xf32>,
    } else {
    }
    %c0 = arith.constant 0 : index
    %c0_1 = arith.constant 0 : index
    %3 = vector.load %arg6[%c0, %c0_1] : memref<64x96xf32, #tpu.memory_space<vmem>>, vector<64x96xf32>
    %c0_2 = arith.constant 0 : index
    %c0_3 = arith.constant 0 : index
    %4 = vector.load %arg3[%c0_2, %c0_3] : memref<64x32xbf16, #tpu.memory_space<vmem>>, vector<64x32xbf16>
    %c0_4 = arith.constant 0 : index
    %c0_5 = arith.constant 0 : index
    %5 = vector.load %arg4[%c0_4, %c0_5] : memref<32x96xbf16, #tpu.memory_space<vmem>>, vector<32x96xbf16>
    %cst = arith.constant dense<0.000000e+00> : vector<64x96xf32>
    %6 = tpu.matmul %4, %5, %cst {dimension_numbers = #tpu.dot_dimension_numbers<[1], [0], [0], [1], [0, 0, 1, 1], [], []>} : vector<64x32xbf16>, vector<32x96xbf16>, vector<64x96xf32> -> vector<64x96xf32>
    %7 = arith.addf %3, %6 : vector<64x96xf32>
    %c0_6 = arith.constant 0 : index
    %c0_7 = arith.constant 0 : index
    %8 = vector.load %arg6[%c0_6, %c0_7] : memref<64x96xf32, #tpu.memory_space<vmem>>, vector<64x96xf32>
    tpu.vector_store %arg6[%c0_6, %c0_7], %7 {strides = array<i32>} : memref<64x96xf32, #tpu.memory_space<vmem>>, vector<64x96xf32>,
    %c0_i32_8 = arith.constant 0 : i32
    %9 = arith.cmpi eq, %arg2, %c0_i32_8 : i32
    %10 = arith.extui %9 : i1 to i32
    %c0_i32_9 = arith.constant 0 : i32
    %11 = arith.cmpi ne, %10, %c0_i32_9 : i32
    scf.if %11 {
      %c0_10 = arith.constant 0 : index
      %c0_11 = arith.constant 0 : index
      %12 = vector.load %arg6[%c0_10, %c0_11] : memref<64x96xf32, #tpu.memory_space<vmem>>, vector<64x96xf32>
      %13 = arith.truncf %12 : vector<64x96xf32> to vector<64x96xbf16>
      %c0_12 = arith.constant 0 : index
      %c0_13 = arith.constant 0 : index
      %14 = vector.load %arg5[%c0_12, %c0_13] : memref<64x96xbf16, #tpu.memory_space<vmem>>, vector<64x96xbf16>
      tpu.vector_store %arg5[%c0_12, %c0_13], %13 {strides = array<i32>} : memref<64x96xbf16, #tpu.memory_space<vmem>>, vector<64x96xbf16>,
    } else {
    }
    return
  }
  func.func @transform_0(%arg0: i32, %arg1: i32, %arg2: i32) -> (i32, i32) {
    %c0_i32 = arith.constant 0 : i32
    return %arg0, %arg2 : i32, i32
  }
  func.func @transform_1(%arg0: i32, %arg1: i32, %arg2: i32) -> (i32, i32) {
    %c0_i32 = arith.constant 0 : i32
    return %arg2, %arg1 : i32, i32
  }
  func.func @transform_2(%arg0: i32, %arg1: i32, %arg2: i32) -> (i32, i32) {
    %c0_i32 = arith.constant 0 : i32
    return %arg0, %arg1 : i32, i32
  }
}

</mosaic_0001>

<bundles_post_ra>
// kernel: tpu_custom_call.1
= control target key start
LH: loop header
LB: loop body
LE: loop exit
PB: predicated region body
PF: predicated region fallthrough
CT: control target
= control target key end

     0   :  { %vm78_vm0 = vcmask 261120   ;;  %vm17_vm1 = vcmask 785408   ;;  %v323_v4 = vmov 0.0   ;;  %s400_s0 = inlined_call_operand.vmem [shape: bf16[64,32], index: 0, kind: input, shape index: {}]   ;;  %s401_s1 = inlined_call_operand.vmem [shape: bf16[32,96], index: 1, kind: input, shape index: {}]   ;;  %s402_s2 = inlined_call_operand.hbm [shape: bf16[64,96], index: 2, kind: output, shape index: {}]  }
   0x1   :  { %v293_v0 = vld [vmem:[%s401_s1] sm:$0xff]   ;;  %v294_v1 = vld [vmem:[%s401_s1 + $0x8] sm:$0xff]   ;;  %v296_v3 = vld [vmem:[%s400_s0 + $0x10] sm:$0xff]   ;;  %20 = vst.msk [vmem:[#allocation2 + $0x10] sm:$0xff] %vm17_vm1, %v323_v4 }
   0x2   :  { %273 = vmatprep.subr.bf16.mxu0 %v293_v0  ;;  %285 = vmatprep.subr.bf16.mxu1 %v293_v0  ;;  %v295_v2 = vld [vmem:[%s400_s0] sm:$0xff]   ;;  %18 = vst.msk [vmem:[#allocation2] sm:$0xff] %vm17_vm1, %v323_v4  ;;  %19 = vst.msk [vmem:[#allocation2 + $0x8] sm:$0xff] %vm17_vm1, %v323_v4  ;;  %v297_v5 = vld [vmem:[%s400_s0 + $0x8] sm:$0xff]  }
   0x3   :  { %274 = vmatpush3.bf16.msra.mxu0 %v293_v0  ;;  %287 = vmatpush3.bf16.msra.mxu1 %v293_v0  ;;  %21 = vst.msk [vmem:[#allocation2 + $0x18] sm:$0xff] %vm17_vm1, %v323_v4  ;;  %22 = vst.msk [vmem:[#allocation2 + $0x20] sm:$0xff] %vm17_vm1, %v323_v4  ;;  %v298_v6 = vld [vmem:[%s400_s0 + $0x18] sm:$0xff]  }
   0x4   :  { %23 = vst.msk [vmem:[#allocation2 + $0x28] sm:$0xff] %vm17_vm1, %v323_v4  ;;  %24 = vst.msk [vmem:[#allocation2 + $0x30] sm:$0xff] %vm17_vm1, %v323_v4  ;;  %275 = vmatprep.subr.bf16.mxu0 %v294_v1  ;;  %286 = vmatprep.subr.bf16.mxu1 %v294_v1 }
   0x5   :  { %25 = vst.msk [vmem:[#allocation2 + $0x38] sm:$0xff] %vm17_vm1, %v323_v4  ;;  %277 = vmatprep.mubr.msk.bf16.mxu0 %vm78_vm0, %v295_v2  ;;  %281 = vmatprep.mubr.msk.bf16.mxu1 %vm78_vm0, %v296_v3 }
   0x6   :  { %7 = vsyncpa [#allocation4], 0  ;;  %vm216_vm2 = vcmask 781312   ;;  %s324_s0 = smov [#allocation3]  }
   0x7   :  { %276 = vmatpush3.bf16.msra.mxu0 %v294_v1  ;;  %288 = vmatpush3.bf16.msra.mxu1 %v294_v1  ;;  %s230_s20 = sshll.u32 %s324_s0, 4  ;;  %s231_s20 = int_to_ptr.vmem [resolvable:$true] %s230_s20 }
   0x8   :  { %v28_v7 = vld [vmem:[#allocation2 + $0x10] sm:$0xff]  ;;  %s299_s21 = scalar_lea.vmem %s231_s20, 512  ;;  %p304_p1 = scmp.lt.s32.totalorder %s231_s20, %s231_s20 }
   0x9   :  { %v26_v9 = vld [vmem:[#allocation2] sm:$0xff]  ;;  %v27_v19 = vld [vmem:[#allocation2 + $0x8] sm:$0xff]  ;;  %p300_p0 = scmp.ne.s32.totalorder %s231_s20, %s299_s21  ;;  %p305_p2 = scmp.lt.s32.totalorder %s299_s21, %s299_s21 }
   0xa   :  { %278 = vmatmul.mubr.msk.bf16.vlgmr.msra.gmra.mrb[0].mxu0 %vm78_vm0, %v297_v5  ;;  %282 = vmatmul.mubr.msk.bf16.vlgmr.msra.gmra.mrb[0].mxu1 %vm78_vm0, %v298_v6  ;;  %v30_v10 = vld [vmem:[#allocation2 + $0x20] sm:$0xff]  ;;  %v29_v13 = vld [vmem:[#allocation2 + $0x18] sm:$0xff] }
   0xb   :  { %v32_v8 = vld [vmem:[#allocation2 + $0x30] sm:$0xff]  ;;  %v31_v20 = vld [vmem:[#allocation2 + $0x28] sm:$0xff]  ;;  %p306_p3 = por %p305_p2, %p304_p1 }
   0xc   :  { %v33_v14 = vld [vmem:[#allocation2 + $0x38] sm:$0xff] }
   0xd   :  { %p307_p4 = pnand %p306_p3, %p300_p0 }
  0xdd   :  { %v279_v11 = vpop.f32.mrb[0].mxu0  ;;  %v283_v12 = vpop.f32.mrb[0].mxu1 }
  0xde   :  { %v158_v15 = vadd.f32 %v279_v11, %v28_v7  ;;  %v162_v16 = vadd.f32 %v283_v12, %v32_v8  ;;  %v125_v17 = vpop.f32.mrb[1].mxu0  ;;  %v141_v18 = vpop.f32.mrb[1].mxu1 }
  0xdf   :  { %v156_v21 = vadd.f32 %v125_v17, %v26_v9  ;;  %v160_v22 = vadd.f32 %v141_v18, %v30_v10  ;;  %v280_v23 = vpop.f32.mrb[2].mxu0  ;;  %v284_v24 = vpop.f32.mrb[2].mxu1 }
  0xe0   :  { %167 = vst.msk [vmem:[#allocation2 + $0x10] sm:$0xff] %vm17_vm1, %v158_v15  ;;  %171 = vst.msk [vmem:[#allocation2 + $0x30] sm:$0xff] %vm17_vm1, %v162_v16  ;;  %v159_v25 = vadd.f32 %v280_v23, %v29_v13  ;;  %v163_v26 = vadd.f32 %v284_v24, %v33_v14  ;;  %v128_v27 = vpop.f32.mrb[3].mxu0  ;;  %v144_v28 = vpop.f32.mrb[3].mxu1 }
  0xe1   :  { %165 = vst.msk [vmem:[#allocation2] sm:$0xff] %vm17_vm1, %v156_v21  ;;  %169 = vst.msk [vmem:[#allocation2 + $0x20] sm:$0xff] %vm17_vm1, %v160_v22  ;;  %v157_v29 = vadd.f32 %v128_v27, %v27_v19  ;;  %v161_v30 = vadd.f32 %v144_v28, %v31_v20 }
  0xe2   :  { %168 = vst.msk [vmem:[#allocation2 + $0x18] sm:$0xff] %vm17_vm1, %v159_v25  ;;  %172 = vst.msk [vmem:[#allocation2 + $0x38] sm:$0xff] %vm17_vm1, %v163_v26 }
  0xe3   :  { %166 = vst.msk [vmem:[#allocation2 + $0x8] sm:$0xff] %vm17_vm1, %v157_v29  ;;  %170 = vst.msk [vmem:[#allocation2 + $0x28] sm:$0xff] %vm17_vm1, %v161_v30 }
  0xe7   :  { %v178_v31 = vld [vmem:[#allocation2 + $0x10] sm:$0xff] }
  0xe8   :  { %v182_v32 = vld [vmem:[#allocation2 + $0x30] sm:$0xff]  ;;  %v176_v33 = vld [vmem:[#allocation2] sm:$0xff]  ;;  %v261_v35 = vpack.c.bf16 %v178_v31, %v178_v31 }
  0xe9   :  { %v180_v34 = vld [vmem:[#allocation2 + $0x20] sm:$0xff]  ;;  %v265_v36 = vpack.c.bf16 %v182_v32, %v182_v32  ;;  %v179_v37 = vld [vmem:[#allocation2 + $0x18] sm:$0xff]  ;;  %v259_v39 = vpack.c.bf16 %v176_v33, %v176_v33 }
  0xea   :  { %v183_v38 = vld [vmem:[#allocation2 + $0x38] sm:$0xff]  ;;  %v263_v40 = vpack.c.bf16 %v180_v34, %v180_v34  ;;  %v177_v41 = vld [vmem:[#allocation2 + $0x8] sm:$0xff]  ;;  %v262_v43 = vpack.c.bf16 %v179_v37, %v179_v37  ;;  %219 = vst.msk [vmem:[#allocation3 + $0x8] sm:$0xf] %vm216_vm2, %v261_v35 }
  0xeb   :  { %v181_v42 = vld [vmem:[#allocation2 + $0x28] sm:$0xff]  ;;  %v266_v44 = vpack.c.bf16 %v183_v38, %v183_v38  ;;  %223 = vst.msk [vmem:[#allocation3 + $0x18] sm:$0xf] %vm216_vm2, %v265_v36  ;;  %v260_v45 = vpack.c.bf16 %v177_v41, %v177_v41  ;;  %217 = vst.msk [vmem:[#allocation3] sm:$0xf] %vm216_vm2, %v259_v39 }
  0xec   :  { %v264_v46 = vpack.c.bf16 %v181_v42, %v181_v42  ;;  %221 = vst.msk [vmem:[#allocation3 + $0x10] sm:$0xf] %vm216_vm2, %v263_v40  ;;  %220 = vst.msk [vmem:[#allocation3 + $0xc] sm:$0xf] %vm216_vm2, %v262_v43 }
  0xed   :  { %224 = vst.msk [vmem:[#allocation3 + $0x1c] sm:$0xf] %vm216_vm2, %v266_v44  ;;  %218 = vst.msk [vmem:[#allocation3 + $0x4] sm:$0xf] %vm216_vm2, %v260_v45 }
  0xee   :  { %222 = vst.msk [vmem:[#allocation3 + $0x14] sm:$0xf] %vm216_vm2, %v264_v46 }
  0xef   :  { %310 = shalt.err (!%p307_p4)
}
  0xf0   :  { %s311_s24 = scalar_lea.hbm %s402_s2, 512 }
  0xf1   :  { %p312_p5 = scmp.ne.s32.totalorder %s402_s2, %s311_s24  ;;  %p315_p6 = scmp.lt.u32.totalorder %s311_s24, %s402_s2 }
  0xf3   :  { %p317_p7 = pnand %p315_p6, %p312_p5 }
  0xf5   :  { %320 = shalt.err (!%p317_p7)
}
  0xf6   :  { %s325_s29 = smov 64   ;;  %s326_s30 = smov 4  }
  0xf7   :  { %236 = dma.vmem_to_hbm [thread:$0]  %s231_s20, 512, %s402_s2, [#allocation4], %s325_s29, %s325_s29, %s326_s30  }
  0xf8   :  { %321 = dma.done.wait [#allocation4], 512  }
  0xf9   :  { %322 = vsyncadd [#allocation4], 4294966784 }
  0xfa   :  { %240 = vsyncpa [#allocation4], 1 }

</bundles_post_ra>
